<compile_context>
chip_gen: v7x
topology: tpu7x:2x2x1
jax: 0.10.0
libtpu: 0.0.40
codegen_flags: <defaults>
</compile_context>

<pallas_src>
import jax
import jax.numpy as jnp
from jax.experimental import pallas as pl
from jax.experimental.pallas import tpu as pltpu

LATENT = 32
HIDDEN = 128
OUT = 28 * 28  # 784


def _round_up(n, m):
    return ((n + m - 1) // m) * m


def decoder_mini_kernel(x_ref, w1_ref, b1_ref, w2_ref, b2_ref, o_ref):
    # x_ref:  (tb, LATENT)     bf16
    # w1_ref: (LATENT, HIDDEN) bf16   (resident: constant index_map)
    # b1_ref: (1, HIDDEN)      f32
    # w2_ref: (HIDDEN, OUT)    bf16   (resident)
    # b2_ref: (1, OUT)         f32
    # o_ref:  (tb, OUT)        bf16
    x = x_ref[...]
    h = jnp.dot(x, w1_ref[...], preferred_element_type=jnp.float32) + b1_ref[...]
    h = jnp.maximum(h, 0.0)                                   # ReLU in f32
    y = jnp.dot(h.astype(jnp.bfloat16), w2_ref[...],
                preferred_element_type=jnp.float32) + b2_ref[...]
    # sigmoid(y) == 0.5 * (tanh(0.5*y) + 1): single EUP op; mul/add on the VPU.
    o_ref[...] = (0.5 * (jnp.tanh(0.5 * y) + 1.0)).astype(o_ref.dtype)


def prepare_decoder_params(w1, b1, w2, b2):
    """One-time weight prep (hoisted out of the forward hot path).

    w1: (LATENT, HIDDEN) f32, b1: (HIDDEN,) or (1, HIDDEN) f32,
    w2: (HIDDEN, OUT)    f32, b2: (OUT,)    or (1, OUT)    f32.
    Returns bf16 matmul weights and (1, N) f32 biases.
    """
    return (
        w1.astype(jnp.bfloat16),
        jnp.asarray(b1, jnp.float32).reshape(1, HIDDEN),
        w2.astype(jnp.bfloat16),
        jnp.asarray(b2, jnp.float32).reshape(1, OUT),
    )


def decoder_mini_forward(x, params, *, tb=1024, out_dtype=jnp.bfloat16):
    """x: (B, LATENT) f32/bf16; params from prepare_decoder_params().

    Returns (B, 1, 28, 28) in `out_dtype` (bf16 by default; cast downstream
    only if exact-f32 sigmoid values are truly required).
    Tuning: tb=1024 for v6e/v7x (keep grid length even and >=2 on v7x for
    megacore), tb=512 is enough on v5e.
    """
    w1_bf, b1, w2_bf, b2 = params
    B = x.shape[0]

    # Batch tile: large to amortize per-step overhead, shrunk (8-row aligned)
    # for tiny batches to avoid huge padding.
    tb = min(tb, _round_up(B, 8))
    b_pad = _round_up(B, tb)
    if b_pad != B:
        x = jnp.pad(x, ((0, b_pad - B), (0, 0)))
    x_bf = x.astype(jnp.bfloat16)

    grid = (b_pad // tb,)
    y = pl.pallas_call(
        decoder_mini_kernel,
        out_shape=jax.ShapeDtypeStruct((b_pad, OUT), out_dtype),
        grid_spec=pl.GridSpec(
            grid=grid,
            in_specs=[
                pl.BlockSpec((tb, LATENT), lambda i: (i, 0)),       # x tile
                pl.BlockSpec((LATENT, HIDDEN), lambda i: (0, 0)),   # w1 (resident)
                pl.BlockSpec((1, HIDDEN), lambda i: (0, 0)),        # b1 (resident)
                pl.BlockSpec((HIDDEN, OUT), lambda i: (0, 0)),      # w2 (resident)
                pl.BlockSpec((1, OUT), lambda i: (0, 0)),           # b2 (resident)
            ],
            # OUT=784 equals the full last dim of the out array, so this block
            # shape is legal; no 896-lane pad and no post-kernel slice pass.
            out_specs=pl.BlockSpec((tb, OUT), lambda i: (i, 0)),
        ),
        compiler_params=pltpu.CompilerParams(
            dimension_semantics=("parallel",),      # megacore sharding on v7x
            vmem_limit_bytes=32 * 1024 * 1024,      # ~3.5 MB/step at tb=1024 (bf16 out)
        ),
    )(x_bf, w1_bf, b1, w2_bf, b2)

    # Only the batch padding (if any) needs stripping; no lane padding exists.
    if b_pad != B:
        y = y[:B]
    return y.reshape(-1, 1, 28, 28)


def init_params(key):
    # Deterministic init mimicking nn.Linear default (uniform in +/- 1/sqrt(fan_in)).
    k1, k2, k3, k4 = jax.random.split(key, 4)
    lim1 = 1.0 / jnp.sqrt(jnp.float32(LATENT))
    lim2 = 1.0 / jnp.sqrt(jnp.float32(HIDDEN))
    w1 = jax.random.uniform(k1, (LATENT, HIDDEN), jnp.float32, -lim1, lim1)
    b1 = jax.random.uniform(k2, (HIDDEN,), jnp.float32, -lim1, lim1)
    w2 = jax.random.uniform(k3, (HIDDEN, OUT), jnp.float32, -lim2, lim2)
    b2 = jax.random.uniform(k4, (OUT,), jnp.float32, -lim2, lim2)
    return w1, b1, w2, b2


if __name__ == "__main__":
    key = jax.random.PRNGKey(0)
    k_in, k_par = jax.random.split(key)
    B = 2
    x = jax.random.normal(k_in, (B, LATENT), jnp.float32)
    w1, b1, w2, b2 = init_params(k_par)

    # Weight prep is done once, outside the per-call path.
    params = prepare_decoder_params(w1, b1, w2, b2)

    out = decoder_mini_forward(x, params)
    out = jax.block_until_ready(out)

    # sanity: shape and sigmoid range
    assert out.shape == (B, 1, 28, 28), out.shape
    out_f32 = out.astype(jnp.float32)
    assert bool(jnp.all(out_f32 >= -1e-3)) and bool(jnp.all(out_f32 <= 1.0 + 1e-3))

    # reference check in plain f32 JAX (kernel uses bf16 matmul operands and a
    # bf16 output, so compare with an appropriately loose tolerance).
    ref = jax.nn.sigmoid(jnp.maximum(x @ w1 + b1, 0.0) @ w2 + b2).reshape(-1, 1, 28, 28)
    max_err = float(jnp.max(jnp.abs(out_f32 - ref)))
    assert max_err < 2.5e-2, max_err

    print("KERNEL_OK")
</pallas_src>

<mosaic_0001>
module attributes {stable_mosaic.version = 11 : i64} {
  func.func @decoder_mini_kernel(%arg0: i32, %arg1: memref<8x32xbf16, #tpu.memory_space<vmem>>, %arg2: memref<32x128xbf16, #tpu.memory_space<vmem>>, %arg3: memref<1x128xf32, #tpu.memory_space<vmem>>, %arg4: memref<128x784xbf16, #tpu.memory_space<vmem>>, %arg5: memref<1x784xf32, #tpu.memory_space<vmem>>, %arg6: memref<8x784xbf16, #tpu.memory_space<vmem>>) attributes {dimension_semantics = [#tpu.dimension_semantics<parallel>], iteration_bounds = array<i64: 1>, scalar_prefetch = 0 : i64, scratch_operands = 0 : i64, tpu.core_type = #tpu.core_type<tc>, window_params = [{transform_indices = @transform_0, window_bounds = array<i64: 8, 32>}, {pipeline_mode = #tpu.pipeline_mode<synchronous>, transform_indices = @transform_1, window_bounds = array<i64: 32, 128>}, {pipeline_mode = #tpu.pipeline_mode<synchronous>, transform_indices = @transform_2, window_bounds = array<i64: 1, 128>}, {pipeline_mode = #tpu.pipeline_mode<synchronous>, transform_indices = @transform_3, window_bounds = array<i64: 128, 784>}, {pipeline_mode = #tpu.pipeline_mode<synchronous>, transform_indices = @transform_4, window_bounds = array<i64: 1, 784>}, {transform_indices = @transform_5, window_bounds = array<i64: 8, 784>}]} {
    %c0 = arith.constant 0 : index
    %c0_0 = arith.constant 0 : index
    %0 = vector.load %arg1[%c0, %c0_0] : memref<8x32xbf16, #tpu.memory_space<vmem>>, vector<8x32xbf16>
    %c0_1 = arith.constant 0 : index
    %c0_2 = arith.constant 0 : index
    %1 = vector.load %arg2[%c0_1, %c0_2] : memref<32x128xbf16, #tpu.memory_space<vmem>>, vector<32x128xbf16>
    %cst = arith.constant dense<0.000000e+00> : vector<8x128xf32>
    %2 = tpu.matmul %0, %1, %cst {dimension_numbers = #tpu.dot_dimension_numbers<[1], [0], [0], [1], [0, 0, 1, 1], [], []>} : vector<8x32xbf16>, vector<32x128xbf16>, vector<8x128xf32> -> vector<8x128xf32>
    %c0_3 = arith.constant 0 : index
    %c0_4 = arith.constant 0 : index
    %3 = vector.load %arg3[%c0_3, %c0_4] : memref<1x128xf32, #tpu.memory_space<vmem>>, vector<1x128xf32>
    %4 = vector.broadcast %3 : vector<1x128xf32> to vector<8x128xf32>
    %5 = arith.addf %2, %4 : vector<8x128xf32>
    %cst_5 = arith.constant 0.000000e+00 : f32
    %6 = vector.broadcast %cst_5 : f32 to vector<8x128xf32>
    %7 = arith.maximumf %5, %6 : vector<8x128xf32>
    %8 = arith.truncf %7 : vector<8x128xf32> to vector<8x128xbf16>
    %c0_6 = arith.constant 0 : index
    %c0_7 = arith.constant 0 : index
    %9 = vector.load %arg4[%c0_6, %c0_7] : memref<128x784xbf16, #tpu.memory_space<vmem>>, vector<128x784xbf16>
    %cst_8 = arith.constant dense<0.000000e+00> : vector<8x784xf32>
    %10 = tpu.matmul %8, %9, %cst_8 {dimension_numbers = #tpu.dot_dimension_numbers<[1], [0], [0], [1], [0, 0, 1, 1], [], []>} : vector<8x128xbf16>, vector<128x784xbf16>, vector<8x784xf32> -> vector<8x784xf32>
    %c0_9 = arith.constant 0 : index
    %c0_10 = arith.constant 0 : index
    %11 = vector.load %arg5[%c0_9, %c0_10] : memref<1x784xf32, #tpu.memory_space<vmem>>, vector<1x784xf32>
    %12 = vector.broadcast %11 : vector<1x784xf32> to vector<8x784xf32>
    %13 = arith.addf %10, %12 : vector<8x784xf32>
    %cst_11 = arith.constant 5.000000e-01 : f32
    %14 = vector.broadcast %cst_11 : f32 to vector<8x784xf32>
    %15 = arith.mulf %14, %13 : vector<8x784xf32>
    %16 = math.tanh %15 : vector<8x784xf32>
    %cst_12 = arith.constant 1.000000e+00 : f32
    %17 = vector.broadcast %cst_12 : f32 to vector<8x784xf32>
    %18 = arith.addf %16, %17 : vector<8x784xf32>
    %cst_13 = arith.constant 5.000000e-01 : f32
    %19 = vector.broadcast %cst_13 : f32 to vector<8x784xf32>
    %20 = arith.mulf %19, %18 : vector<8x784xf32>
    %21 = arith.truncf %20 : vector<8x784xf32> to vector<8x784xbf16>
    %c0_14 = arith.constant 0 : index
    %c0_15 = arith.constant 0 : index
    %22 = vector.load %arg6[%c0_14, %c0_15] : memref<8x784xbf16, #tpu.memory_space<vmem>>, vector<8x784xbf16>
    tpu.vector_store %arg6[%c0_14, %c0_15], %21 {strides = array<i32>} : memref<8x784xbf16, #tpu.memory_space<vmem>>, vector<8x784xbf16>,
    return
  }
  func.func @transform_0(%arg0: i32) -> (i32, i32) {
    %c0_i32 = arith.constant 0 : i32
    %c0_i32_0 = arith.constant 0 : i32
    return %arg0, %c0_i32 : i32, i32
  }
  func.func @transform_1(%arg0: i32) -> (i32, i32) {
    %c0_i32 = arith.constant 0 : i32
    %c0_i32_0 = arith.constant 0 : i32
    %c0_i32_1 = arith.constant 0 : i32
    return %c0_i32, %c0_i32_0 : i32, i32
  }
  func.func @transform_2(%arg0: i32) -> (i32, i32) {
    %c0_i32 = arith.constant 0 : i32
    %c0_i32_0 = arith.constant 0 : i32
    %c0_i32_1 = arith.constant 0 : i32
    return %c0_i32, %c0_i32_0 : i32, i32
  }
  func.func @transform_3(%arg0: i32) -> (i32, i32) {
    %c0_i32 = arith.constant 0 : i32
    %c0_i32_0 = arith.constant 0 : i32
    %c0_i32_1 = arith.constant 0 : i32
    return %c0_i32, %c0_i32_0 : i32, i32
  }
  func.func @transform_4(%arg0: i32) -> (i32, i32) {
    %c0_i32 = arith.constant 0 : i32
    %c0_i32_0 = arith.constant 0 : i32
    %c0_i32_1 = arith.constant 0 : i32
    return %c0_i32, %c0_i32_0 : i32, i32
  }
  func.func @transform_5(%arg0: i32) -> (i32, i32) {
    %c0_i32 = arith.constant 0 : i32
    %c0_i32_0 = arith.constant 0 : i32
    return %arg0, %c0_i32 : i32, i32
  }
}

</mosaic_0001>

<bundles_post_ra>
// kernel: tpu_custom_call.1
= control target key start
LH: loop header
LB: loop body
LE: loop exit
PB: predicated region body
PF: predicated region fallthrough
CT: control target
= control target key end

     0   :  { %v952_v1 = vmov 0.0   ;;  %vm953_vm0 = vmmov 0   ;;  %vm46_vm1 = vcmask 261120   ;;  %s1195_s0 = inlined_call_operand.vmem [shape: bf16[8,32], index: 0, kind: input, shape index: {}]   ;;  %s1196_s1 = inlined_call_operand.vmem [shape: bf16[32,128], index: 1, kind: input, shape index: {}]   ;;  %s1197_s2 = inlined_call_operand.vmem [shape: f32[1,128], index: 2, kind: input, shape index: {}]   ;;  %s1198_s3 = inlined_call_operand.vmem [shape: bf16[128,784], index: 3, kind: input, shape index: {}]   ;;  %s1199_s4 = inlined_call_operand.vmem [shape: f32[1,784], index: 4, kind: input, shape index: {}]   ;;  %s1200_s5 = inlined_call_operand.hbm [shape: bf16[8,784], index: 5, kind: output, shape index: {}]  }
   0x1   :  { %v832_v0 = vld [vmem:[%s1196_s1] sm:$0xff]   ;;  %800 = vmatprep.subr.bf16.mxu0 %v952_v1  ;;  %v833_v2 = vld [vmem:[%s1196_s1 + $0x8] sm:$0xff]   ;;  %804 = vmatprep.mubr.msk.bf16.mxu0 %vm953_vm0, %v952_v1  ;;  %v840_v7 = vld [vmem:[%s1198_s3 + $0x3c] ss:$28 sps:$4 sm:$0xff]  }
   0x2   :  { %801 = vmatpush3.bf16.msra.mxu0 %v832_v0  ;;  %v834_v3 = vld [vmem:[%s1198_s3 + $0x4] ss:$28 sps:$4 sm:$0xff]   ;;  %v838_v5 = vld [vmem:[%s1198_s3 + $0xc] ss:$28 sps:$4 sm:$0xff]   ;;  %v845_v10 = vld [vmem:[%s1198_s3 + $0x38] ss:$28 sps:$4 sm:$0xff]  }
   0x3   :  { %802 = vmatprep.subr.bf16.mxu0 %v952_v1  ;;  %v22_v4 = vld [vmem:[%s1195_s0] sm:$0xf]  ;;  %481 = vmatprep.subr.bf16.mxu1 %v834_v3  ;;  %v836_v8 = vld [vmem:[%s1198_s3 + $0x8] ss:$28 sps:$4 sm:$0xff]   ;;  %v846_v11 = vld [vmem:[%s1198_s3 + $0x74] ss:$28 sps:$4 sm:$0xff]  }
   0x4   :  { %v839_v6 = vld [vmem:[%s1198_s3] ss:$28 sps:$4 sm:$0xff]   ;;  %v851_v14 = vld [vmem:[%s1198_s3 + $0x70] ss:$28 sps:$4 sm:$0xff]   ;;  %v848_v16 = vld [vmem:[%s1198_s3 + $0x78] ss:$28 sps:$4 sm:$0xff]  }
   0x5   :  { %482 = vmatpush1.bf16.msra.mxu1 %v839_v6  ;;  %v844_v9 = vld [vmem:[%s1198_s3 + $0x44] ss:$28 sps:$4 sm:$0xff]   ;;  %v850_v13 = vld [vmem:[%s1198_s3 + $0x7c] ss:$28 sps:$4 sm:$0xff]   ;;  %v852_v15 = vld [vmem:[%s1198_s3 + $0xac] ss:$28 sps:$4 sm:$0xff]  }
   0x6   :  { %803 = vmatpush3.bf16.msra.mxu0 %v833_v2  ;;  %483 = vmatprep.subr.bf16.mxu1 %v840_v7  ;;  %v842_v12 = vld [vmem:[%s1198_s3 + $0x40] ss:$28 sps:$4 sm:$0xff]   ;;  %v857_v17 = vld [vmem:[%s1198_s3 + $0xa8] ss:$28 sps:$4 sm:$0xff]   ;;  %v856_v18 = vld [vmem:[%s1198_s3 + $0xb4] ss:$28 sps:$4 sm:$0xff]  }
   0x7   :  { %522 = vmatprep.subr.bf16.mxu0 %v838_v5  ;;  %v858_v19 = vld [vmem:[%s1198_s3 + $0xe4] ss:$28 sps:$4 sm:$0xff]   ;;  %v854_v20 = vld [vmem:[%s1198_s3 + $0xb0] ss:$28 sps:$4 sm:$0xff]   ;;  %v864_v23 = vld [vmem:[%s1198_s3 + $0x11c] ss:$28 sps:$4 sm:$0xff]  }
   0x8   :  { %v862_v21 = vld [vmem:[%s1198_s3 + $0xec] ss:$28 sps:$4 sm:$0xff]   ;;  %v863_v22 = vld [vmem:[%s1198_s3 + $0xe0] ss:$28 sps:$4 sm:$0xff]   ;;  %v869_v25 = vld [vmem:[%s1198_s3 + $0x118] ss:$28 sps:$4 sm:$0xff]  }
   0x9   :  { %805 = vmatmul.mubr.msk.bf16.vlgmr.msra.gmra.mrb[0].mxu0 %vm46_vm1, %v22_v4  ;;  %484 = vmatpush1.bf16.msra.mxu1 %v845_v10  ;;  %v860_v24 = vld [vmem:[%s1198_s3 + $0xe8] ss:$28 sps:$4 sm:$0xff]   ;;  %v870_v27 = vld [vmem:[%s1198_s3 + $0x154] ss:$28 sps:$4 sm:$0xff]   ;;  %v866_v28 = vld [vmem:[%s1198_s3 + $0x120] ss:$28 sps:$4 sm:$0xff]  }
   0xa   :  { %523 = vmatpush1.bf16.msra.mxu0 %v836_v8  ;;  %485 = vmatprep.subr.bf16.mxu1 %v846_v11  ;;  %v868_v26 = vld [vmem:[%s1198_s3 + $0x124] ss:$28 sps:$4 sm:$0xff]   ;;  %v875_v29 = vld [vmem:[%s1198_s3 + $0x150] ss:$28 sps:$4 sm:$0xff]   ;;  %v874_v30 = vld [vmem:[%s1198_s3 + $0x15c] ss:$28 sps:$4 sm:$0xff]  }
   0xb   :  { %524 = vmatprep.subr.bf16.mxu0 %v844_v9  ;;  %v872_v31 = vld [vmem:[%s1198_s3 + $0x158] ss:$28 sps:$4 sm:$0xff]  }
   0xd   :  { %486 = vmatpush1.bf16.msra.mxu1 %v851_v14 }
   0xe   :  { %525 = vmatpush1.bf16.msra.mxu0 %v842_v12  ;;  %487 = vmatprep.subr.bf16.mxu1 %v852_v15 }
   0xf   :  { %526 = vmatprep.subr.bf16.mxu0 %v850_v13 }
  0x11   :  { %488 = vmatpush1.bf16.msra.mxu1 %v857_v17 }
  0x12   :  { %527 = vmatpush1.bf16.msra.mxu0 %v848_v16  ;;  %489 = vmatprep.subr.bf16.mxu1 %v858_v19 }
  0x13   :  { %528 = vmatprep.subr.bf16.mxu0 %v856_v18 }
  0x15   :  { %490 = vmatpush1.bf16.msra.mxu1 %v863_v22 }
  0x16   :  { %529 = vmatpush1.bf16.msra.mxu0 %v854_v20  ;;  %491 = vmatprep.subr.bf16.mxu1 %v864_v23 }
  0x17   :  { %530 = vmatprep.subr.bf16.mxu0 %v862_v21 }
  0x19   :  { %492 = vmatpush1.bf16.msra.mxu1 %v869_v25 }
  0x1a   :  { %531 = vmatpush1.bf16.msra.mxu0 %v860_v24  ;;  %493 = vmatprep.subr.bf16.mxu1 %v870_v27 }
  0x1b   :  { %532 = vmatprep.subr.bf16.mxu0 %v868_v26 }
  0x1d   :  { %494 = vmatpush1.bf16.msra.mxu1 %v875_v29 }
  0x1e   :  { %533 = vmatpush1.bf16.msra.mxu0 %v866_v28 }
  0x1f   :  { %534 = vmatprep.subr.bf16.mxu0 %v874_v30 }
  0x20   :  { %10 = vsyncpa [#allocation3], 0  ;;  %v876_v32 = vld [vmem:[%s1198_s3 + $0x18c] ss:$28 sps:$4 sm:$0xff]   ;;  %v880_v33 = vld [vmem:[%s1198_s3 + $0x194] ss:$28 sps:$4 sm:$0xff]   ;;  %v158_v6 = vlaneseq }
  0x21   :  { %v878_v34 = vld [vmem:[%s1198_s3 + $0x190] ss:$28 sps:$4 sm:$0xff]   ;;  %v881_v35 = vld [vmem:[%s1198_s3 + $0x188] ss:$28 sps:$4 sm:$0xff]   ;;  %495 = vmatprep.subr.bf16.mxu1 %v876_v32  ;;  %v954_v37 = vmov 0   ;;  %vm704_vm2 = vcmask 125952  }
  0x22   :  { %535 = vmatpush1.bf16.msra.mxu0 %v872_v31  ;;  %496 = vmatpush1.bf16.msra.mxu1 %v881_v35  ;;  %v884_v36 = vld [vmem:[%s1198_s3 + $0x14] ss:$28 sps:$4 sm:$0xff]   ;;  %v720_v38 = vld [vmem:[%s1197_s2] ss:$0 sm:$0xff]  ;;  %v888_v48 = vld [vmem:[%s1198_s3 + $0x4c] ss:$28 sps:$4 sm:$0xff]  }
  0x23   :  { %536 = vmatprep.subr.bf16.mxu0 %v880_v33  ;;  %513 = vmatprep.mubr.bf16.mxu1 %v954_v37  ;;  %v882_v45 = vld [vmem:[%s1198_s3 + $0x10] ss:$28 sps:$4 sm:$0xff]   ;;  %v885_v46 = vld [vmem:[%s1198_s3 + $0x18] ss:$28 sps:$4 sm:$0xff]   ;;  %v886_v49 = vld [vmem:[%s1198_s3 + $0x48] ss:$28 sps:$4 sm:$0xff]  }
  0x24   :  { %554 = vmatprep.mubr.bf16.mxu0 %v954_v37  ;;  %563 = vmatprep.subr.bf16.mxu1 %v884_v36  ;;  %v889_v50 = vld [vmem:[%s1198_s3 + $0x50] ss:$28 sps:$4 sm:$0xff]   ;;  %v892_v51 = vld [vmem:[%s1198_s3 + $0x84] ss:$28 sps:$4 sm:$0xff]   ;;  %v896_v54 = vld [vmem:[%s1198_s3 + $0xbc] ss:$28 sps:$4 sm:$0xff]  }
  0x25   :  { %v890_v52 = vld [vmem:[%s1198_s3 + $0x80] ss:$28 sps:$4 sm:$0xff]   ;;  %v893_v53 = vld [vmem:[%s1198_s3 + $0x88] ss:$28 sps:$4 sm:$0xff]   ;;  %v894_v55 = vld [vmem:[%s1198_s3 + $0xb8] ss:$28 sps:$4 sm:$0xff]  }
  0x26   :  { %537 = vmatpush1.bf16.msra.mxu0 %v878_v34  ;;  %v897_v56 = vld [vmem:[%s1198_s3 + $0xc0] ss:$28 sps:$4 sm:$0xff]   ;;  %v900_v57 = vld [vmem:[%s1198_s3 + $0xf4] ss:$28 sps:$4 sm:$0xff]   ;;  %v904_v60 = vld [vmem:[%s1198_s3 + $0x12c] ss:$28 sps:$4 sm:$0xff]  }
  0x27   :  { %808 = vmatprep.subr.bf16.mxu0 %v952_v1  ;;  %v898_v58 = vld [vmem:[%s1198_s3 + $0xf0] ss:$28 sps:$4 sm:$0xff]   ;;  %v901_v59 = vld [vmem:[%s1198_s3 + $0xf8] ss:$28 sps:$4 sm:$0xff]   ;;  %v902_v61 = vld [vmem:[%s1198_s3 + $0x128] ss:$28 sps:$4 sm:$0xff]  }
  0x28   :  { %v905_v62 = vld [vmem:[%s1198_s3 + $0x130] ss:$28 sps:$4 sm:$0xff]   ;;  %v908_v63 = vld [vmem:[%s1198_s3 + $0x164] ss:$28 sps:$4 sm:$0xff]   ;;  %v912_v3 = vld [vmem:[%s1198_s3 + $0x19c] ss:$28 sps:$4 sm:$0xff]  }
  0x29   :  { %v906_v0 = vld [vmem:[%s1198_s3 + $0x160] ss:$28 sps:$4 sm:$0xff]   ;;  %v909_v2 = vld [vmem:[%s1198_s3 + $0x168] ss:$28 sps:$4 sm:$0xff]   ;;  %v910_v4 = vld [vmem:[%s1198_s3 + $0x198] ss:$28 sps:$4 sm:$0xff]  }
  0x2a   :  { %v913_v5 = vld [vmem:[%s1198_s3 + $0x1a0] ss:$28 sps:$4 sm:$0xff]   ;;  %v159_v7 = vshrl.u32 %v158_v6, 7  ;;  %s955_s3 = smov [#allocation2]  }
  0x2b   :  { %v156_v10 = vld [vmem:[%s1199_s4] sm:$0x7f]  ;;  %s712_s4 = sshll.u32 %s955_s3, 4  ;;  %s713_s4 = int_to_ptr.vmem [resolvable:$true] %s712_s4 }
  0x2c   :  { %v160_v8 = vsub.s32 0, %v159_v7  ;;  %v168_v9 = vsub.s32 2, %v159_v7  ;;  %v164_v11 = vsub.s32 1, %v159_v7  ;;  %v172_v12 = vsub.s32 3, %v159_v7  ;;  %s928_s29 = scalar_lea.vmem %s713_s4, 448  ;;  %p933_p1 = scmp.lt.s32.totalorder %s713_s4, %s713_s4 }
  0x2d   :  { %p929_p0 = scmp.ne.s32.totalorder %s713_s4, %s928_s29  ;;  %p934_p2 = scmp.lt.s32.totalorder %s928_s29, %s928_s29 }
  0x2e   :  { %v161_v13 = vrot.slane %v156_v10, %v160_v8  ;;  %v169_v14 = vrot.slane %v156_v10, %v168_v9  ;;  %v165_v15 = vrot.slane %v156_v10, %v164_v11  ;;  %v173_v16 = vrot.slane %v156_v10, %v172_v12 }
  0x2f   :  { %p935_p3 = por %p934_p2, %p933_p1 }
  0x31   :  { %p936_p4 = pnand %p935_p3, %p929_p0 }
  0xdc   :  { %v84_v39 = vpop.f32.mrb[0].mxu0 }
  0xdd   :  { %v85_v40 = vadd.f32 %v720_v38, %v84_v39  ;;  %v806_v41 = vpop.f32.mrb[1].mxu0 }
  0xde   :  { %v87_v42 = vpop.f32.mrb[2].mxu0 }
  0xdf   :  { %v90_v43 = vmax.f32 %v85_v40, 0.0  ;;  %v807_v44 = vpop.f32.mrb[3].mxu0 }
  0xe1   :  { %v91_v47 = vpack.c.bf16 %v90_v43, %v90_v43 }
  0xe3   :  { %514 = vmatmul.mubr.bf16.vlgmr.msra.gmra.mrb[0].mxu1 %v91_v47  ;;  %555 = vmatmul.mubr.bf16.vlgmr.msra.gmra.mrb[4].mxu0 %v91_v47 }
  0xe4   :  { %564 = vmatpush1.bf16.msra.mxu1 %v882_v45  ;;  %809 = vmatpush3.bf16.msra.mxu0 %v885_v46  ;;  %v176_v46 = vsub.s32 4, %v159_v7 }
  0xe5   :  { %565 = vmatprep.subr.bf16.mxu1 %v888_v48  ;;  %810 = vmatprep.subr.bf16.mxu0 %v952_v1  ;;  %v180_v48 = vsub.s32 5, %v159_v7 }
  0xe6   :  { %595 = vmatprep.mubr.bf16.mxu1 %v954_v37  ;;  %824 = vmatprep.mubr.msk.bf16.mxu0 %vm953_vm0, %v952_v1 }
  0xe8   :  { %566 = vmatpush1.bf16.msra.mxu1 %v886_v49  ;;  %811 = vmatpush3.bf16.msra.mxu0 %v889_v50  ;;  %v177_v49 = vrot.slane %v156_v10, %v176_v46 }
  0xe9   :  { %567 = vmatprep.subr.bf16.mxu1 %v892_v51  ;;  %812 = vmatprep.subr.bf16.mxu0 %v952_v1  ;;  %v181_v51 = vrot.slane %v156_v10, %v180_v48 }
  0xec   :  { %568 = vmatpush1.bf16.msra.mxu1 %v890_v52  ;;  %813 = vmatpush3.bf16.msra.mxu0 %v893_v53 }
  0xed   :  { %569 = vmatprep.subr.bf16.mxu1 %v896_v54  ;;  %814 = vmatprep.subr.bf16.mxu0 %v952_v1 }
  0xf0   :  { %570 = vmatpush1.bf16.msra.mxu1 %v894_v55  ;;  %815 = vmatpush3.bf16.msra.mxu0 %v897_v56 }
  0xf1   :  { %571 = vmatprep.subr.bf16.mxu1 %v900_v57  ;;  %816 = vmatprep.subr.bf16.mxu0 %v952_v1 }
  0xf4   :  { %572 = vmatpush1.bf16.msra.mxu1 %v898_v58  ;;  %817 = vmatpush3.bf16.msra.mxu0 %v901_v59 }
  0xf5   :  { %573 = vmatprep.subr.bf16.mxu1 %v904_v60  ;;  %818 = vmatprep.subr.bf16.mxu0 %v952_v1 }
  0xf8   :  { %574 = vmatpush1.bf16.msra.mxu1 %v902_v61  ;;  %819 = vmatpush3.bf16.msra.mxu0 %v905_v62 }
  0xf9   :  { %575 = vmatprep.subr.bf16.mxu1 %v908_v63  ;;  %820 = vmatprep.subr.bf16.mxu0 %v952_v1 }
  0xfc   :  { %576 = vmatpush1.bf16.msra.mxu1 %v906_v0  ;;  %821 = vmatpush3.bf16.msra.mxu0 %v909_v2 }
  0xfd   :  { %577 = vmatprep.subr.bf16.mxu1 %v912_v3  ;;  %822 = vmatprep.subr.bf16.mxu0 %v952_v1 }
 0x100   :  { %578 = vmatpush1.bf16.msra.mxu1 %v910_v4  ;;  %823 = vmatpush3.bf16.msra.mxu0 %v913_v5 }
 0x103   :  { %596 = vmatmul.mubr.bf16.vlgmr.msra.gmra.mrb[4].mxu1 %v91_v47  ;;  %825 = vmatmul.mubr.bf16.vlgmr.msra.gmra.mrb[8].mxu0 %v91_v47  ;;  %v184_v47 = vsub.s32 6, %v159_v7 }
 0x105   :  { %v185_v50 = vrot.slane %v156_v10, %v184_v47 }
 0x1b6   :  { %v515_v17 = vpop.f32.mrb[0].mxu1  ;;  %v556_v1 = vpop.f32.mrb[4].mxu0 }
 0x1b7   :  { %v516_v18 = vadd.f32 %v515_v17, %v161_v13  ;;  %v557_v19 = vadd.f32 %v556_v1, %v169_v14  ;;  %v517_v20 = vpop.f32.mrb[1].mxu1  ;;  %v558_v21 = vpop.f32.mrb[5].mxu0 }
 0x1b8   :  { %v518_v22 = vadd.f32 %v517_v20, %v165_v15  ;;  %v559_v23 = vadd.f32 %v558_v21, %v173_v16  ;;  %v519_v24 = vpop.f32.mrb[2].mxu1  ;;  %v560_v25 = vpop.f32.mrb[6].mxu0 }
 0x1b9   :  { %v644_v26 = vmul.f32 0.5, %v516_v18  ;;  %v646_v27 = vmul.f32 0.5, %v557_v19  ;;  %v520_v28 = vpop.f32.mrb[3].mxu1  ;;  %v561_v29 = vpop.f32.mrb[7].mxu0 }
 0x1ba   :  { %v645_v30 = vmul.f32 0.5, %v518_v22  ;;  %v647_v31 = vmul.f32 0.5, %v559_v23 }
 0x1bb   :  { %914 = vtanh.f32 %v644_v26 }
 0x1bc   :  { %916 = vtanh.f32 %v646_v27 }
 0x1bd   :  { %918 = vtanh.f32 %v645_v30 }
 0x1be   :  { %920 = vtanh.f32 %v647_v31 }
 0x1c5   :  { %v915_v32 = vpop.eup %914 }
 0x1c6   :  { %v917_v33 = vpop.eup %916  ;;  %v658_v34 = vadd.f32 1.0, %v915_v32 }
 0x1c7   :  { %v919_v35 = vpop.eup %918  ;;  %v660_v36 = vadd.f32 1.0, %v917_v33 }
 0x1c8   :  { %v921_v37 = vpop.eup %920  ;;  %v665_v38 = vmul.f32 0.5, %v658_v34  ;;  %v659_v39 = vadd.f32 1.0, %v919_v35 }
 0x1c9   :  { %v667_v40 = vmul.f32 0.5, %v660_v36  ;;  %v661_v41 = vadd.f32 1.0, %v921_v37 }
 0x1ca   :  { %v666_v42 = vmul.f32 0.5, %v659_v39 }
 0x1cb   :  { %v668_v43 = vmul.f32 0.5, %v661_v41 }
 0x1cc   :  { %v784_v44 = vpack.c.bf16 %v666_v42, %v665_v38 }
 0x1cd   :  { %v785_v45 = vpack.c.bf16 %v668_v43, %v667_v40 }
 0x1ce   :  { %701 = vst [vmem:[#allocation2] sm:$0xff] %v784_v44 }
 0x1cf   :  { %702 = vst [vmem:[#allocation2 + $0x8] sm:$0xff] %v785_v45 }
 0x1d6   :  { %v597_v52 = vpop.f32.mrb[4].mxu1  ;;  %v638_v53 = vpop.f32.mrb[8].mxu0 }
 0x1d7   :  { %v598_v54 = vadd.f32 %v597_v52, %v177_v49  ;;  %v639_v55 = vadd.f32 %v638_v53, %v185_v50  ;;  %v599_v56 = vpop.f32.mrb[5].mxu1  ;;  %v826_v57 = vpop.f32.mrb[9].mxu0 }
 0x1d8   :  { %v600_v58 = vadd.f32 %v599_v56, %v181_v51  ;;  %v601_v59 = vpop.f32.mrb[6].mxu1  ;;  %v641_v60 = vpop.f32.mrb[10].mxu0 }
 0x1d9   :  { %v648_v61 = vmul.f32 0.5, %v598_v54  ;;  %v650_v62 = vmul.f32 0.5, %v639_v55  ;;  %v602_v63 = vpop.f32.mrb[7].mxu1  ;;  %v827_v0 = vpop.f32.mrb[11].mxu0 }
 0x1da   :  { %v649_v2 = vmul.f32 0.5, %v600_v58 }
 0x1db   :  { %922 = vtanh.f32 %v648_v61 }
 0x1dc   :  { %924 = vtanh.f32 %v650_v62 }
 0x1dd   :  { %926 = vtanh.f32 %v649_v2 }
 0x1e5   :  { %v923_v3 = vpop.eup %922 }
 0x1e6   :  { %v925_v4 = vpop.eup %924  ;;  %v662_v5 = vadd.f32 1.0, %v923_v3 }
 0x1e7   :  { %v927_v6 = vpop.eup %926  ;;  %v664_v7 = vadd.f32 1.0, %v925_v4 }
 0x1e8   :  { %v669_v8 = vmul.f32 0.5, %v662_v5  ;;  %v663_v9 = vadd.f32 1.0, %v927_v6 }
 0x1e9   :  { %v671_v10 = vmul.f32 0.5, %v664_v7 }
 0x1ea   :  { %v670_v11 = vmul.f32 0.5, %v663_v9 }
 0x1eb   :  { %v787_v12 = vpack.c.bf16 %v671_v10, %v671_v10 }
 0x1ec   :  { %v786_v13 = vpack.c.bf16 %v670_v11, %v669_v8 }
 0x1ed   :  { %705 = vst.msk [vmem:[#allocation2 + $0x18] sm:$0xf] %vm704_vm2, %v787_v12 }
 0x1ee   :  { %703 = vst [vmem:[#allocation2 + $0x10] sm:$0xff] %v786_v13 }
 0x1ef   :  { %939 = shalt.err (!%p936_p4)
}
 0x1f0   :  { %s940_s7 = scalar_lea.hbm %s1200_s5, 448 }
 0x1f1   :  { %p941_p5 = scmp.ne.s32.totalorder %s1200_s5, %s940_s7  ;;  %p944_p6 = scmp.lt.u32.totalorder %s940_s7, %s1200_s5 }
 0x1f3   :  { %p946_p7 = pnand %p944_p6, %p941_p5 }
 0x1f5   :  { %949 = shalt.err (!%p946_p7)
}
 0x1f6   :  { %715 = dma.vmem_to_hbm [thread:$0]  %s713_s4, 448, %s1200_s5, [#allocation3]  }
 0x1f7   :  { %950 = dma.done.wait [#allocation3], 448  }
 0x1f8   :  { %951 = vsyncadd [#allocation3], 4294966848 }
 0x1f9   :  { %719 = vsyncpa [#allocation3], 1 }

</bundles_post_ra>
